<compile_context>
chip_gen: v7x
topology: tpu7x:2x2x1
jax: 0.10.0
libtpu: 0.0.40
codegen_flags: <defaults>
</compile_context>

<pallas_src>
import math

import jax
import jax.numpy as jnp
from jax.experimental import pallas as pl
from jax.experimental.pallas import tpu as pltpu

H = 512  # hidden size, as in the PyTorch module


def _round_up(x, m):
    return (x + m - 1) // m * m


def _choose_batch_tile(B, b_tile=512):
    """Batch tile: multiple of 16 (bf16 sublane packing), as large as possible
    (up to b_tile) to amortize per-grid-step overhead, but split into >=2 grid
    steps for larger batches so both v7x TensorCores participate."""
    bt = min(b_tile, _round_up(B, 16))
    if B > 256:
        steps = max(2, pl.cdiv(B, bt))
        bt = _round_up(pl.cdiv(B, steps), 16)
    return bt


def critic_kernel(x_ref, w1_ref, b1_ref, w2_ref, b2_ref, o_ref):
    # x_ref:  (bt, D)  bf16  -- [s, a] concatenated (fused first layer, one K=D push)
    # w1_ref: (D, H)   bf16  -- fc.weight^T, VMEM-resident
    # b1_ref: (1, H)   f32   -- fc.bias
    # w2_ref: (8, H)   f32   -- row 0 = v_head.weight, rows 1..7 zero (pads M to a sublane tile)
    # b2_ref: (1, 1)   f32   -- v_head.bias, SMEM scalar
    # o_ref:  (1, bt)  f32   -- lane-dense row of state values for this batch tile
    h = jnp.dot(x_ref[...], w1_ref[...], preferred_element_type=jnp.float32)  # (bt, H) f32
    h = jnp.maximum(h + b1_ref[...], 0.0)  # bias + ReLU in f32 (VPU)
    # Value head as w2 @ h^T on the MXU (NT dims): result (8, bt) is already
    # lane-dense, so the store below is a full-width row (no masked (bt, 1)
    # column stores) and no XLU cross-lane reduction is needed.
    v = jax.lax.dot_general(
        w2_ref[...], h,
        dimension_numbers=(((1,), (1,)), ((), ())),
        preferred_element_type=jnp.float32)  # (8, bt) f32
    o_ref[...] = v[0:1, :] + b2_ref[0, 0]


def critic_forward(s, a, prep, *, b_tile=512):
    """Pallas-backed CriticNet.forward(s, a). Returns (B, 1) float32."""
    B = s.shape[0]
    w1, b1, w2r, b2 = prep["w1"], prep["b1"], prep["w2_rows"], prep["b2"]
    D, H_ = w1.shape

    # Fused concat: one (B, D) bf16 operand -> single K=D MXU push in-kernel.
    x = jnp.concatenate([s, a], axis=1).astype(jnp.bfloat16)
    assert x.shape[1] == D

    bt = _choose_batch_tile(B, b_tile)
    G = pl.cdiv(B, bt)
    Bp = G * bt
    if Bp != B:
        x = jnp.pad(x, ((0, Bp - B), (0, 0)))

    out3 = pl.pallas_call(
        critic_kernel,
        out_shape=jax.ShapeDtypeStruct((G, 1, bt), jnp.float32),
        grid=(G,),
        in_specs=[
            pl.BlockSpec((bt, D), lambda i: (i, 0)),            # x batch tile
            pl.BlockSpec((D, H_), lambda i: (0, 0)),            # W1 (VMEM-resident)
            pl.BlockSpec((1, H_), lambda i: (0, 0)),            # b1 (VMEM-resident)
            pl.BlockSpec((8, H_), lambda i: (0, 0)),            # w2 rows (VMEM-resident)
            pl.BlockSpec(memory_space=pltpu.MemorySpace.SMEM),  # b2 scalar in SMEM
        ],
        # Lane-dense output: one (1, bt) row per grid step.
        out_specs=pl.BlockSpec((None, 1, bt), lambda i: (i, 0, 0)),
        compiler_params=pltpu.CompilerParams(
            dimension_semantics=("parallel",)),
    )(x, w1, b1, w2r, b2)

    # (G, 1, bt) -> (Bp, 1); drop padded rows.
    return out3.reshape(Bp, 1)[:B]


def init_params(key, state_dim, action_dim):
    """Deterministic init mimicking torch.nn.Linear default U(-1/sqrt(fan_in), +)."""
    D = state_dim + action_dim
    k1, k2, k3, k4, k5, k6 = jax.random.split(key, 6)

    def unif(k, shape, fan_in):
        bound = 1.0 / math.sqrt(fan_in)
        return jax.random.uniform(k, shape, jnp.float32, -bound, bound)

    return {
        # fc: Linear(D, H) — stored transposed (in, out)
        "w1": unif(k1, (D, H), D),
        "b1": unif(k2, (1, H), D),
        # l2: Linear(H, H) — created in __init__ but dead in forward
        # (intermediate_layer == False)
        "w_l2": unif(k3, (H, H), H),
        "b_l2": unif(k4, (1, H), H),
        # v_head: Linear(H, 1)
        "w2": unif(k5, (H, 1), H),
        "b2": unif(k6, (1, 1), H),
    }


def prepare_params(params):
    """One-time, out-of-hot-path prep of kernel-ready parameter tensors."""
    D, H_ = params["w1"].shape
    w2_rows = jnp.zeros((8, H_), jnp.float32).at[0, :].set(
        params["w2"].reshape(H_).astype(jnp.float32))
    return {
        "w1": params["w1"].astype(jnp.bfloat16),              # (D, H) bf16 MXU operand
        "b1": params["b1"].astype(jnp.float32).reshape(1, H_),
        "w2_rows": w2_rows,                                   # (8, H) f32, row 0 real
        "b2": params["b2"].astype(jnp.float32).reshape(1, 1),
    }


def reference_forward_f32(s, a, params):
    x = jnp.concatenate([s, a], axis=1)
    h1 = jnp.maximum(x @ params["w1"] + params["b1"], 0.0)
    return h1 @ params["w2"] + params["b2"]


def reference_forward_bf16(s, a, params):
    # Same bf16-operand / f32-accumulate first layer as the kernel.
    x = jnp.concatenate([s, a], axis=1).astype(jnp.bfloat16)
    h1 = jnp.dot(x, params["w1"].astype(jnp.bfloat16),
                 preferred_element_type=jnp.float32) + params["b1"]
    h1 = jnp.maximum(h1, 0.0)
    return h1 @ params["w2"] + params["b2"]


if __name__ == "__main__":
    key = jax.random.PRNGKey(0)
    k_params = jax.random.fold_in(key, 0)

    state_dim, action_dim = 12, 4
    params = init_params(k_params, state_dim, action_dim)
    prep = prepare_params(params)          # hoisted out of the per-call hot path
    fwd = jax.jit(critic_forward)

    # batch=8  -> single-step grid (tiny-tile path)
    # batch=300 -> 2-step grid with batch padding (multi-core / lane-dense path)
    for batch in (8, 300):
        ks, ka = jax.random.split(jax.random.fold_in(key, batch))
        s = jax.random.normal(ks, (batch, state_dim), jnp.float32)
        a = jax.random.normal(ka, (batch, action_dim), jnp.float32)

        out = jax.block_until_ready(fwd(s, a, prep))
        assert out.shape == (batch, 1)

        ref_bf16 = reference_forward_bf16(s, a, params)
        assert jnp.allclose(out, ref_bf16, atol=1e-2, rtol=1e-2), (out, ref_bf16)

        ref_f32 = reference_forward_f32(s, a, params)
        assert jnp.allclose(out, ref_f32, atol=5e-2, rtol=5e-2), (out, ref_f32)

    # TODO(synk): the l2 + dropout branch is dead code (intermediate_layer=False)
    # and is intentionally not lowered; its params are still initialized for parity.
    print("KERNEL_OK")
</pallas_src>

<mosaic_0001>
module attributes {stable_mosaic.version = 11 : i64} {
  func.func @critic_kernel(%arg0: i32, %arg1: memref<16x16xbf16, #tpu.memory_space<vmem>>, %arg2: memref<16x512xbf16, #tpu.memory_space<vmem>>, %arg3: memref<1x512xf32, #tpu.memory_space<vmem>>, %arg4: memref<8x512xf32, #tpu.memory_space<vmem>>, %arg5: memref<1x1xf32, #tpu.memory_space<smem>>, %arg6: memref<1x1x16xf32, #tpu.memory_space<vmem>>) attributes {dimension_semantics = [#tpu.dimension_semantics<parallel>], iteration_bounds = array<i64: 1>, scalar_prefetch = 0 : i64, scratch_operands = 0 : i64, tpu.core_type = #tpu.core_type<tc>, window_params = [{transform_indices = @transform_0, window_bounds = array<i64: 16, 16>}, {pipeline_mode = #tpu.pipeline_mode<synchronous>, transform_indices = @transform_1, window_bounds = array<i64: 16, 512>}, {pipeline_mode = #tpu.pipeline_mode<synchronous>, transform_indices = @transform_2, window_bounds = array<i64: 1, 512>}, {pipeline_mode = #tpu.pipeline_mode<synchronous>, transform_indices = @transform_3, window_bounds = array<i64: 8, 512>}, {transform_indices = @transform_4, window_bounds = array<i64: 1, 1>}, {transform_indices = @transform_5, window_bounds = array<i64: 1, 1, 16>}]} {
    %c0 = arith.constant 0 : index
    %c0_0 = arith.constant 0 : index
    %0 = vector.load %arg1[%c0, %c0_0] : memref<16x16xbf16, #tpu.memory_space<vmem>>, vector<16x16xbf16>
    %c0_1 = arith.constant 0 : index
    %c0_2 = arith.constant 0 : index
    %1 = vector.load %arg2[%c0_1, %c0_2] : memref<16x512xbf16, #tpu.memory_space<vmem>>, vector<16x512xbf16>
    %cst = arith.constant dense<0.000000e+00> : vector<16x512xf32>
    %2 = tpu.matmul %0, %1, %cst {dimension_numbers = #tpu.dot_dimension_numbers<[1], [0], [0], [1], [0, 0, 1, 1], [], []>} : vector<16x16xbf16>, vector<16x512xbf16>, vector<16x512xf32> -> vector<16x512xf32>
    %c0_3 = arith.constant 0 : index
    %c0_4 = arith.constant 0 : index
    %3 = vector.load %arg3[%c0_3, %c0_4] : memref<1x512xf32, #tpu.memory_space<vmem>>, vector<1x512xf32>
    %4 = vector.broadcast %3 : vector<1x512xf32> to vector<16x512xf32>
    %5 = arith.addf %2, %4 : vector<16x512xf32>
    %cst_5 = arith.constant 0.000000e+00 : f32
    %6 = vector.broadcast %cst_5 : f32 to vector<16x512xf32>
    %7 = arith.maximumf %5, %6 : vector<16x512xf32>
    %c0_6 = arith.constant 0 : index
    %c0_7 = arith.constant 0 : index
    %8 = vector.load %arg4[%c0_6, %c0_7] : memref<8x512xf32, #tpu.memory_space<vmem>>, vector<8x512xf32>
    %cst_8 = arith.constant dense<0.000000e+00> : vector<8x16xf32>
    %9 = tpu.matmul %8, %7, %cst_8 {dimension_numbers = #tpu.dot_dimension_numbers<[1], [1], [0], [0], [0, 0, 1, 0], [], []>} : vector<8x512xf32>, vector<16x512xf32>, vector<8x16xf32> -> vector<8x16xf32>
    %10 = vector.extract_strided_slice %9 {offsets = [0, 0], sizes = [1, 16], strides = [1, 1]} : vector<8x16xf32> to vector<1x16xf32>
    %c0_9 = arith.constant 0 : index
    %c0_10 = arith.constant 0 : index
    %11 = memref.load %arg5[%c0_9, %c0_10] : memref<1x1xf32, #tpu.memory_space<smem>>
    %12 = vector.broadcast %11 : f32 to vector<1x16xf32>
    %13 = arith.addf %10, %12 : vector<1x16xf32>
    %c0_11 = arith.constant 0 : index
    %c0_12 = arith.constant 0 : index
    %c0_13 = arith.constant 0 : index
    %14 = vector.load %arg6[%c0_11, %c0_12, %c0_13] : memref<1x1x16xf32, #tpu.memory_space<vmem>>, vector<1x1x16xf32>
    %15 = vector.shape_cast %14 : vector<1x1x16xf32> to vector<1x16xf32>
    %16 = vector.shape_cast %13 : vector<1x16xf32> to vector<1x1x16xf32>
    tpu.vector_store %arg6[%c0_11, %c0_12, %c0_13], %16 {strides = array<i32>} : memref<1x1x16xf32, #tpu.memory_space<vmem>>, vector<1x1x16xf32>,
    return
  }
  func.func @transform_0(%arg0: i32) -> (i32, i32) {
    %c0_i32 = arith.constant 0 : i32
    %c0_i32_0 = arith.constant 0 : i32
    return %arg0, %c0_i32 : i32, i32
  }
  func.func @transform_1(%arg0: i32) -> (i32, i32) {
    %c0_i32 = arith.constant 0 : i32
    %c0_i32_0 = arith.constant 0 : i32
    %c0_i32_1 = arith.constant 0 : i32
    return %c0_i32, %c0_i32_0 : i32, i32
  }
  func.func @transform_2(%arg0: i32) -> (i32, i32) {
    %c0_i32 = arith.constant 0 : i32
    %c0_i32_0 = arith.constant 0 : i32
    %c0_i32_1 = arith.constant 0 : i32
    return %c0_i32, %c0_i32_0 : i32, i32
  }
  func.func @transform_3(%arg0: i32) -> (i32, i32) {
    %c0_i32 = arith.constant 0 : i32
    %c0_i32_0 = arith.constant 0 : i32
    %c0_i32_1 = arith.constant 0 : i32
    return %c0_i32, %c0_i32_0 : i32, i32
  }
  func.func @transform_4(%arg0: i32) -> (i32, i32) {
    %c0_i32 = arith.constant 0 : i32
    %c0_i32_0 = arith.constant 0 : i32
    %c0_i32_1 = arith.constant 0 : i32
    return %c0_i32, %c0_i32_0 : i32, i32
  }
  func.func @transform_5(%arg0: i32) -> (i32, i32, i32) {
    %c0_i32 = arith.constant 0 : i32
    %c0_i32_0 = arith.constant 0 : i32
    %c0_i32_1 = arith.constant 0 : i32
    return %arg0, %c0_i32, %c0_i32_0 : i32, i32, i32
  }
}

</mosaic_0001>

<bundles_post_ra>
// kernel: critic_forward.1
= control target key start
LH: loop header
LB: loop body
LE: loop exit
PB: predicated region body
PF: predicated region fallthrough
CT: control target
= control target key end

     0   :  { %11 = vsyncpa [#allocation4], 0  ;;  %s387_s18 = smov [#allocation3]   ;;  %s455_s0 = inlined_call_operand.vmem [shape: bf16[16,16], index: 0, kind: input, shape index: {}]   ;;  %s456_s1 = inlined_call_operand.vmem [shape: bf16[16,512], index: 1, kind: input, shape index: {}]   ;;  %s457_s2 = inlined_call_operand.vmem [shape: f32[1,512], index: 2, kind: input, shape index: {}]   ;;  %s458_s3 = inlined_call_operand.hbm [shape: f32[8,512], index: 3, kind: input, shape index: {}]   ;;  %s459_s4 = inlined_call_operand.<no memory space> [shape: f32[1,1], index: 4, kind: input, shape index: {}]   ;;  %s460_s5 = inlined_call_operand.vmem [shape: f32[1,1,16], index: 5, kind: output, shape index: {}]  }
   0x1   :  { %s24_s19 = sshll.u32 %s387_s18, 4  ;;  %s363_s22 = scalar_lea.hbm %s458_s3, 512  ;;  %s25_s19 = int_to_ptr.vmem [resolvable:$true] %s24_s19 }
   0x2   :  { %p364_p0 = scmp.ne.s32.totalorder %s458_s3, %s363_s22  ;;  %p367_p1 = scmp.lt.u32.totalorder %s363_s22, %s458_s3 }
   0x4   :  { %p369_p2 = pnand %p367_p1, %p364_p0 }
   0x6   :  { %372 = shalt.err (!%p369_p2)
}
   0x7   :  { %s373_s27 = scalar_lea.vmem %s25_s19, 512  ;;  %p378_p4 = scmp.lt.s32.totalorder %s25_s19, %s25_s19 }
   0x8   :  { %p374_p3 = scmp.ne.s32.totalorder %s25_s19, %s373_s27  ;;  %p379_p5 = scmp.lt.s32.totalorder %s373_s27, %s373_s27 }
   0xa   :  { %p380_p6 = por %p379_p5, %p378_p4 }
   0xc   :  { %p381_p7 = pnand %p380_p6, %p374_p3 }
   0xe   :  { %384 = shalt.err (!%p381_p7)
}
   0xf   :  { %27 = dma.hbm_to_vmem [thread:$0]  %s458_s3, 512, %s25_s19, [#allocation4]  }
  0x10   :  { %385 = dma.done.wait [#allocation4], 512  }
  0x11   :  { %386 = vsyncadd [#allocation4], 4294966784  ;;  %v388_v0 = vmov 0   ;;  %v356_v1 = vld [vmem:[%s456_s1 + $0x4] ss:$16 sps:$4 sm:$0xff]   ;;  %vm87_vm0 = vcmask 130048   ;;  %v42_v8 = vlaneseq  ;;  %v330_v51 = vstv %s459_s4 }
  0x12   :  { %123 = vmatprep.mubr.bf16.mxu0 %v388_v0  ;;  %166 = vmatprep.mubr.bf16.mxu1 %v388_v0  ;;  %v358_v2 = vld [vmem:[%s456_s1 + $0xc] ss:$16 sps:$4 sm:$0xff]   ;;  %v360_v3 = vld [vmem:[%s456_s1] ss:$16 sps:$4 sm:$0xff]   ;;  %v361_v4 = vld [vmem:[%s456_s1 + $0x8] ss:$16 sps:$4 sm:$0xff]  }
  0x13   :  { %91 = vmatprep.subr.bf16.mxu0 %v356_v1  ;;  %134 = vmatprep.subr.bf16.mxu1 %v358_v2  ;;  %v362_v5 = vld [vmem:[%s455_s0] sm:$0xff]   ;;  %v186_v6 = vld [vmem:[#allocation3 + $0x8] sm:$0xff]  ;;  %v188_v7 = vld [vmem:[#allocation3 + $0x18] sm:$0xff]  ;;  %v43_v9 = vshrl.u32 %v42_v8, 7  ;;  %vm332_vm1 = vcmask 122880  }
  0x14   :  { %92 = vmatpush1.bf16.msra.mxu0 %v360_v3  ;;  %135 = vmatpush1.bf16.msra.mxu1 %v361_v4  ;;  %v40_v12 = vld [vmem:[%s457_s2] sm:$0xf]  ;;  %v187_v48 = vld [vmem:[#allocation3 + $0x10] sm:$0xff] }
  0x15   :  { %v44_v10 = vsub.s32 0, %v43_v9  ;;  %v52_v11 = vsub.s32 2, %v43_v9  ;;  %v48_v13 = vsub.s32 1, %v43_v9  ;;  %v56_v14 = vsub.s32 3, %v43_v9  ;;  %v185_v47 = vld [vmem:[#allocation3] sm:$0xff] }
  0x17   :  { %344 = vmatmul.mubr.msk.bf16.vlgmr.msra.gmra.mrb[0].mxu0 %vm87_vm0, %v362_v5  ;;  %345 = vmatmul.mubr.msk.bf16.vlgmr.msra.gmra.mrb[0].mxu1 %vm87_vm0, %v362_v5  ;;  %v45_v15 = vrot.slane %v40_v12, %v44_v10  ;;  %v53_v16 = vrot.slane %v40_v12, %v52_v11  ;;  %v49_v17 = vrot.slane %v40_v12, %v48_v13 }
  0x18   :  { %253 = vmatprep.mubr.f32.mxu0 %v186_v6  ;;  %323 = vmatprep.mubr.f32.mxu1 %v188_v7  ;;  %v57_v18 = vrot.slane %v40_v12, %v56_v14 }
  0xea   :  { %v125_v19 = vpop.f32.mrb[0].mxu0  ;;  %v168_v20 = vpop.f32.mrb[0].mxu1 }
  0xeb   :  { %v126_v21 = vadd.f32 %v125_v19, %v45_v15  ;;  %v169_v22 = vadd.f32 %v168_v20, %v53_v16  ;;  %v127_v23 = vpop.f32.mrb[1].mxu0  ;;  %v170_v24 = vpop.f32.mrb[1].mxu1 }
  0xec   :  { %v128_v25 = vadd.f32 %v127_v23, %v49_v17  ;;  %v171_v26 = vadd.f32 %v170_v24, %v57_v18  ;;  %v129_v27 = vpop.f32.mrb[2].mxu0  ;;  %v172_v28 = vpop.f32.mrb[2].mxu1 }
  0xed   :  { %v130_v29 = vadd.f32 %v129_v27, %v45_v15  ;;  %v173_v30 = vadd.f32 %v172_v28, %v53_v16  ;;  %v131_v31 = vpop.f32.mrb[3].mxu0  ;;  %v174_v32 = vpop.f32.mrb[3].mxu1  ;;  %v177_v35 = vmax.f32 %v126_v21, 0.0  ;;  %v179_v36 = vmax.f32 %v169_v22, 0.0 }
  0xee   :  { %v132_v33 = vadd.f32 %v131_v31, %v49_v17  ;;  %v175_v34 = vadd.f32 %v174_v32, %v57_v18  ;;  %v178_v39 = vmax.f32 %v128_v25, 0.0  ;;  %v180_v40 = vmax.f32 %v171_v26, 0.0 }
  0xef   :  { %v181_v37 = vmax.f32 %v130_v29, 0.0  ;;  %v183_v38 = vmax.f32 %v173_v30, 0.0 }
  0xf0   :  { %v182_v41 = vmax.f32 %v132_v33, 0.0  ;;  %v184_v42 = vmax.f32 %v175_v34, 0.0 }
  0xf1   :  { %v348_v43 = vpack.c.bf16 %v181_v37, %v177_v35  ;;  %v352_v44 = vpack.c.bf16 %v183_v38, %v179_v36 }
  0xf2   :  { %v346_v45 = vpack.c.bf16 %v182_v41, %v178_v39  ;;  %v350_v46 = vpack.c.bf16 %v184_v42, %v180_v40 }
  0xf4   :  { %347 = vmatprep.subr.bf16.mxu0 %v346_v45  ;;  %351 = vmatprep.subr.bf16.mxu1 %v350_v46 }
  0xf5   :  { %349 = vmatpush1.bf16.xpose.msra.mxu0 %v348_v43  ;;  %353 = vmatpush1.bf16.xpose.msra.mxu1 %v352_v44 }
  0xfc   :  { %254 = vmatmul.mubr.f32.vlgmr.msra.gmra.mrb[4].mxu0 %v185_v47  ;;  %324 = vmatmul.mubr.f32.vlgmr.msra.gmra.mrb[4].mxu1 %v187_v48 }
 0x1cf   :  { %v255_v49 = vpop.f32.mrb[4].mxu0  ;;  %v325_v50 = vpop.f32.mrb[4].mxu1 }
 0x1d0   :  { %v326_v52 = vadd.f32 %v325_v50, %v255_v49  ;;  %v257_v53 = vpop.f32.mrb[5].mxu0  ;;  %v327_v54 = vpop.f32.mrb[5].mxu1 }
 0x1d2   :  { %v331_v55 = vadd.f32 %v330_v51, %v326_v52 }
 0x1d4   :  { %333 = vst.msk [vmem:[%s460_s5] sm:$0x1] %vm332_vm1, %v331_v55 }
 0x1d5   :  { %338 = vsyncpa [#allocation4], 1 }

</bundles_post_ra>
